<compile_context>
chip_gen: v7x
topology: tpu7x:2x2x1
jax: 0.10.0
libtpu: 0.0.40
codegen_flags: <defaults>
</compile_context>

<pallas_src>
import jax
import jax.numpy as jnp
from jax.experimental import pallas as pl
from jax.experimental.pallas import tpu as pltpu


def _pow_kernel(allpos_ref, base_ref, exp_ref, o_ref):
    base = base_ref[...].astype(jnp.float32)   # (TM, 1) column sliver
    expo = exp_ref[...].astype(jnp.float32)    # (1, TN) row sliver
    fast = allpos_ref[pl.program_id(0)] != 0   # scalar from SMEM (prefetched)

    @pl.when(fast)
    def _():
        # All bases in this row-block are > 0: exp(y * log(x)) is exact torch
        # semantics; log is hoisted to O(TM) transcendentals instead of O(TM*TN).
        logb = jnp.log(base)
        o_ref[...] = jnp.exp(logb * expo).astype(o_ref.dtype)

    @pl.when(jnp.logical_not(fast))
    def _():
        # Exact fallback for blocks containing bases <= 0 (0**0 == 1, integral
        # exponents of negative bases, NaN otherwise — matches torch / jnp pow).
        o_ref[...] = (base ** expo).astype(o_ref.dtype)


def _round_up(n: int, m: int) -> int:
    return pl.cdiv(n, m) * m


def _xla_pow(x_flat: jax.Array) -> jax.Array:
    n = x_flat.shape[0]
    out = x_flat.reshape(n, 1) ** x_flat.reshape(1, n)
    return out.reshape(1, n * n)


def pallas_pow(
    x: jax.Array,
    *,
    max_tm: int = 512,
    max_tn: int = 4096,
    min_pallas_n: int = 512,
    force_pallas: bool = False,
) -> jax.Array:
    """Pairwise power of the flattened input, matching the torch `Pow` module.

    Returns shape (1, N*N) where N = x.size and out[i*N + j] = x_flat[i] ** x_flat[j].
    """
    orig_dtype = x.dtype
    x_flat = x.reshape(-1)
    n = x_flat.shape[0]

    # Small N: pallas_call launch/pipeline overhead dominates, let XLA fuse it.
    # Non-float dtypes: keep exact XLA semantics.
    # TODO(synk): integer-pow semantics (overflow / negative exponents) are left
    # to XLA; the Pallas path only handles floating dtypes.
    if (not force_pallas and n <= min_pallas_n) or not jnp.issubdtype(
        orig_dtype, jnp.floating
    ):
        return _xla_pow(x_flat)

    # Dtype-aware sublane quantum (f32: 8, bf16: 16, int8/fp8: 32); lanes: 128.
    itemsize = jnp.dtype(orig_dtype).itemsize
    sub = {4: 8, 2: 16, 1: 32}.get(itemsize, 8)
    lane = 128

    # Column (exponent / lane) tiling: wide lane-dense blocks (unmasked vst).
    nc = _round_up(n, lane)
    tn = min(max_tn, nc)          # multiple of 128 (nc is)
    nc = _round_up(n, tn)

    # Row (base / sublane) tiling.
    nr = _round_up(n, sub)
    tm = min(max_tm, nr)
    tm = max(sub, (tm // sub) * sub)
    nr = _round_up(n, tm)

    # Pad only when needed; pad value 1.0 keeps every padded output finite and
    # positive (1**y == 1, x**1 == x) and doesn't disturb the positivity flags.
    base = x_flat
    if nr != n:
        base = jnp.pad(base, (0, nr - n), constant_values=1.0)
    expo = x_flat
    if nc != n:
        expo = jnp.pad(expo, (0, nc - n), constant_values=1.0)

    base2d = base.reshape(nr, 1)
    expo2d = expo.reshape(1, nc)

    grid = (nr // tm, nc // tn)

    # Per row-block "all bases positive" flags -> SMEM scalar prefetch; the
    # kernel's branch is then a plain scalar `pl.when`.
    allpos = (jnp.min(base.reshape(grid[0], tm), axis=1) > 0.0).astype(jnp.int32)

    out_itemsize = jnp.dtype(orig_dtype).itemsize
    cost = pl.CostEstimate(
        flops=2 * nr * nc,
        transcendentals=nr * nc,
        bytes_accessed=nr * nc * out_itemsize + (nr + nc) * itemsize,
    )

    out2d = pl.pallas_call(
        _pow_kernel,
        out_shape=jax.ShapeDtypeStruct((nr, nc), orig_dtype),
        grid_spec=pltpu.PrefetchScalarGridSpec(
            num_scalar_prefetch=1,
            grid=grid,
            in_specs=[
                pl.BlockSpec((tm, 1), lambda i, j, p: (i, 0)),   # base column sliver
                pl.BlockSpec((1, tn), lambda i, j, p: (0, j)),   # exponent row sliver
            ],
            out_specs=pl.BlockSpec((tm, tn), lambda i, j, p: (i, j)),
        ),
        compiler_params=pltpu.CompilerParams(
            # Row axis parallel (megacore shards contiguous output slabs),
            # lane axis innermost so the base sliver's re-DMA is elided.
            dimension_semantics=("parallel", "arbitrary"),
            vmem_limit_bytes=48 * 1024 * 1024,
        ),
        cost_estimate=cost,
    )(allpos, base2d, expo2d)

    if nc == n:
        # Row-only (or no) padding: cheap leading-prefix slice, free reshape.
        out2d = out2d if nr == n else out2d[:n]
        return out2d.reshape(1, n * n)
    # TODO(synk): lane padding forces a full N^2 slice copy here; fuse into the
    # consumer (or keep 2D output) if this matters end-to-end.
    return out2d[:n, :n].reshape(1, n * n)


def _torch_pow_reference(x: jax.Array) -> jax.Array:
    # Mirrors the PyTorch module's forward exactly.
    deno = x.reshape(1, 1, -1)
    num = x.reshape(1, -1, 1)
    out = num ** deno
    return out.reshape(1, -1)


if __name__ == "__main__":
    key = jax.random.PRNGKey(0)
    k1, k2, k3, k4, k5 = jax.random.split(key, 5)

    # 1) Module-consistent case: in_dim = 32 feature vector, positive domain.
    #    Force the Pallas path so the kernel (fast log-hoisted branch) runs.
    x1 = jax.random.uniform(k1, (1, 32), dtype=jnp.float32, minval=0.1, maxval=2.0)
    y1 = pallas_pow(x1, force_pallas=True)
    jax.block_until_ready(y1)
    ref1 = _torch_pow_reference(x1)
    assert y1.shape == ref1.shape and y1.dtype == ref1.dtype
    assert jnp.allclose(y1, ref1, rtol=1e-5, atol=1e-5)

    # 2) Default behavior for small N: XLA fallback, same result.
    y1d = pallas_pow(x1)
    assert jnp.allclose(y1d, ref1, rtol=1e-5, atol=1e-5)

    # 3) Unaligned size exercises the padding/slicing path.
    x2 = jax.random.uniform(k2, (3, 7), dtype=jnp.float32, minval=0.1, maxval=2.0)
    y2 = pallas_pow(x2, force_pallas=True)
    jax.block_until_ready(y2)
    ref2 = _torch_pow_reference(x2)
    assert y2.shape == ref2.shape
    assert jnp.allclose(y2, ref2, rtol=1e-5, atol=1e-5)

    # 4) Mixed-sign / zero bases exercise the exact in-kernel `**` fallback branch.
    x3 = jnp.concatenate(
        [
            jax.random.uniform(k3, (16,), dtype=jnp.float32, minval=0.1, maxval=2.0),
            jnp.array([-2.0, -1.0, 0.0, 1.0, 2.0, 3.0, -0.5, 0.5], jnp.float32),
            jax.random.uniform(k4, (8,), dtype=jnp.float32, minval=0.1, maxval=2.0),
        ]
    ).reshape(1, 32)
    y3 = pallas_pow(x3, force_pallas=True)
    jax.block_until_ready(y3)
    ref3 = _torch_pow_reference(x3)
    assert y3.shape == ref3.shape
    assert jnp.allclose(y3, ref3, rtol=1e-5, atol=1e-5, equal_nan=True)

    # 5) Larger aligned case takes the Pallas path by default and uses the
    #    bigger (512-row) tiles with a multi-step row grid.
    x4 = jax.random.uniform(k5, (1, 1024), dtype=jnp.float32, minval=0.1, maxval=2.0)
    y4 = pallas_pow(x4)
    jax.block_until_ready(y4)
    ref4 = _torch_pow_reference(x4)
    assert y4.shape == ref4.shape
    assert jnp.allclose(y4, ref4, rtol=1e-5, atol=1e-5)

    print("KERNEL_OK")
</pallas_src>

<mosaic_0001>
module attributes {stable_mosaic.version = 11 : i64} {
  func.func @_pow_kernel(%arg0: i32, %arg1: i32, %arg2: memref<1xi32, #tpu.memory_space<smem>>, %arg3: memref<32x1xf32, #tpu.memory_space<vmem>>, %arg4: memref<1x128xf32, #tpu.memory_space<vmem>>, %arg5: memref<32x128xf32, #tpu.memory_space<vmem>>) attributes {dimension_semantics = [#tpu.dimension_semantics<parallel>, #tpu.dimension_semantics<arbitrary>], iteration_bounds = array<i64: 1, 1>, scalar_prefetch = 1 : i64, scratch_operands = 0 : i64, tpu.core_type = #tpu.core_type<tc>, window_params = [{transform_indices = @transform_0, window_bounds = array<i64: 32, 1>}, {transform_indices = @transform_1, window_bounds = array<i64: 1, 128>}, {transform_indices = @transform_2, window_bounds = array<i64: 32, 128>}]} {
    %c0 = arith.constant 0 : index
    %c0_0 = arith.constant 0 : index
    %0 = vector.load %arg3[%c0, %c0_0] : memref<32x1xf32, #tpu.memory_space<vmem>>, vector<32x1xf32>
    %c0_1 = arith.constant 0 : index
    %c0_2 = arith.constant 0 : index
    %1 = vector.load %arg4[%c0_1, %c0_2] : memref<1x128xf32, #tpu.memory_space<vmem>>, vector<1x128xf32>
    %2 = arith.index_cast %arg0 : i32 to index
    %3 = memref.load %arg2[%2] : memref<1xi32, #tpu.memory_space<smem>>
    %c0_i32 = arith.constant 0 : i32
    %4 = arith.cmpi ne, %3, %c0_i32 : i32
    %5 = arith.extui %4 : i1 to i32
    %c0_i32_3 = arith.constant 0 : i32
    %6 = arith.cmpi ne, %5, %c0_i32_3 : i32
    scf.if %6 {
      %10 = math.log %0 : vector<32x1xf32>
      %11 = vector.broadcast %10 : vector<32x1xf32> to vector<32x128xf32>
      %12 = vector.broadcast %1 : vector<1x128xf32> to vector<32x128xf32>
      %13 = arith.mulf %11, %12 : vector<32x128xf32>
      %14 = math.exp %13 : vector<32x128xf32>
      %c0_5 = arith.constant 0 : index
      %c0_6 = arith.constant 0 : index
      %15 = vector.load %arg5[%c0_5, %c0_6] : memref<32x128xf32, #tpu.memory_space<vmem>>, vector<32x128xf32>
      tpu.vector_store %arg5[%c0_5, %c0_6], %14 {strides = array<i32>} : memref<32x128xf32, #tpu.memory_space<vmem>>, vector<32x128xf32>,
    } else {
    }
    %true = arith.constant true
    %7 = arith.xori %4, %true : i1
    %8 = arith.extui %7 : i1 to i32
    %c0_i32_4 = arith.constant 0 : i32
    %9 = arith.cmpi ne, %8, %c0_i32_4 : i32
    scf.if %9 {
      %10 = vector.broadcast %0 : vector<32x1xf32> to vector<32x128xf32>
      %11 = vector.broadcast %1 : vector<1x128xf32> to vector<32x128xf32>
      %12 = math.powf %10, %11 : vector<32x128xf32>
      %c0_5 = arith.constant 0 : index
      %c0_6 = arith.constant 0 : index
      %13 = vector.load %arg5[%c0_5, %c0_6] : memref<32x128xf32, #tpu.memory_space<vmem>>, vector<32x128xf32>
      tpu.vector_store %arg5[%c0_5, %c0_6], %12 {strides = array<i32>} : memref<32x128xf32, #tpu.memory_space<vmem>>, vector<32x128xf32>,
    } else {
    }
    return
  }
  func.func @transform_0(%arg0: i32, %arg1: i32, %arg2: memref<1xi32, #tpu.memory_space<smem>>) -> (i32, i32) {
    %c0_i32 = arith.constant 0 : i32
    %c0_i32_0 = arith.constant 0 : i32
    return %arg0, %c0_i32 : i32, i32
  }
  func.func @transform_1(%arg0: i32, %arg1: i32, %arg2: memref<1xi32, #tpu.memory_space<smem>>) -> (i32, i32) {
    %c0_i32 = arith.constant 0 : i32
    %c0_i32_0 = arith.constant 0 : i32
    return %c0_i32, %arg1 : i32, i32
  }
  func.func @transform_2(%arg0: i32, %arg1: i32, %arg2: memref<1xi32, #tpu.memory_space<smem>>) -> (i32, i32) {
    %c0_i32 = arith.constant 0 : i32
    return %arg0, %arg1 : i32, i32
  }
}

</mosaic_0001>

<bundles_post_ra>
// kernel: tpu_custom_call.1
= control target key start
LH: loop header
LB: loop body
LE: loop exit
PB: predicated region body
PF: predicated region fallthrough
CT: control target
= control target key end

     0   :  { %9 = vsyncpa [#allocation5], 0  ;;  %s835_s0 = inlined_call_operand.<no memory space> [shape: s32[1], index: 0, kind: input, shape index: {}]   ;;  %s836_s1 = inlined_call_operand.vmem [shape: f32[32,1], index: 1, kind: input, shape index: {}]   ;;  %s837_s2 = inlined_call_operand.vmem [shape: f32[1,128], index: 2, kind: input, shape index: {}]   ;;  %s838_s3 = inlined_call_operand.hbm [shape: f32[32,128], index: 3, kind: output, shape index: {}]  }
   0x1   :  { %v14_v0 = vld [vmem:[%s836_s1] sm:$0xff]  ;;  %v15_v1 = vld [vmem:[%s836_s1 + $0x8] sm:$0xff]  ;;  %v16_v2 = vld [vmem:[%s836_s1 + $0x10] sm:$0xff]  ;;  %p128_p0 = scmp.eq.s32.totalorder %s835_s0, 0 }
   0x2   :  { %v17_v3 = vld [vmem:[%s836_s1 + $0x18] sm:$0xff]  ;;  %v445_v4 = vld [vmem:[%s837_s2] sm:$0x1]  ;;  %346 = vlog2.f32 (!%p128_p0), %v16_v2  ;;  %v404_v5 = vmov (!%p128_p0), 0   ;;  %v53_v14 = vlaneseq (!%p128_p0) }
   0x3   :  { %23 = sbr.rel (%p128_p0) target bundleno = 164 (0xa4), region = 13  ;;  %345 = vset.pattern.permute.xlu1 (!%p128_p0), %v404_v5  ;;  %344 = vset.pattern.permute.xlu0 (!%p128_p0), %v404_v5  ;;  %348 = vlog2.f32 (!%p128_p0), %v14_v0 }
   0x4   :  { %350 = vlog2.f32 (!%p128_p0), %v17_v3  ;;  %v54_v15 = vshrl.u32 (!%p128_p0), %v53_v14, 7 }
   0x5   :  { %352 = vlog2.f32 (!%p128_p0), %v15_v1 }
   0x6   :  { %v55_v16 = vsub.s32 (!%p128_p0), 0, %v54_v15 }
   0x8   :  { %v56_v17 = vrot.slane (!%p128_p0), %v445_v4, %v55_v16 }
   0xc   :  { %v347_v6 = vpop.eup %346 }
   0xd   :  { %v349_v7 = vpop.eup %348  ;;  %v29_v8 = vmul.f32 0.6931472, %v347_v6 }
   0xe   :  { %v351_v9 = vpop.eup %350  ;;  %v25_v10 = vmul.f32 0.6931472, %v349_v7 }
   0xf   :  { %v353_v11 = vpop.eup %352  ;;  %44 = vperm.xlu1 %345, %v29_v8   ;;  %v31_v12 = vmul.f32 0.6931472, %v351_v9 }
  0x10   :  { %34 = vperm.xlu0 %344, %v25_v10   ;;  %v27_v13 = vmul.f32 0.6931472, %v353_v11 }
  0x13   :  { %49 = vperm.xlu1 %345, %v31_v12  }
  0x14   :  { %39 = vperm.xlu0 %344, %v27_v13  }
  0x8e   :  { %v45_v18 = vpop.permute.xlu1 %44 }
  0x8f   :  { %v60_v19 = vmul.f32 %v56_v17, %v45_v18  ;;  %v35_v20 = vpop.permute.xlu0 %34 }
  0x90   :  { %v58_v21 = vmul.f32 %v56_v17, %v35_v20 }
  0x91   :  { %v66_v22 = vmul.f32 1.442695, %v60_v19 }
  0x92   :  { %v62_v23 = vmul.f32 1.442695, %v58_v21  ;;  %v50_v24 = vpop.permute.xlu1 %49 }
  0x93   :  { %354 = vpow2.f32 %v66_v22  ;;  %v61_v25 = vmul.f32 %v56_v17, %v50_v24  ;;  %v40_v26 = vpop.permute.xlu0 %39 }
  0x94   :  { %356 = vpow2.f32 %v62_v23  ;;  %v59_v27 = vmul.f32 %v56_v17, %v40_v26 }
  0x95   :  { %v68_v28 = vmul.f32 1.442695, %v61_v25 }
  0x96   :  { %v64_v29 = vmul.f32 1.442695, %v59_v27 }
  0x97   :  { %358 = vpow2.f32 %v68_v28 }
  0x98   :  { %360 = vpow2.f32 %v64_v29 }
  0x9d   :  { %v355_v30 = vpop.eup %354 }
  0x9e   :  { %v357_v31 = vpop.eup %356  ;;  %72 = vst [vmem:[#allocation4 + $0x10] sm:$0xff] %v355_v30 }
  0x9f   :  { %70 = vst [vmem:[#allocation4] sm:$0xff] %v357_v31 }
  0xa1   :  { %v359_v32 = vpop.eup %358 }
  0xa2   :  { %v361_v33 = vpop.eup %360  ;;  %73 = vst [vmem:[#allocation4 + $0x18] sm:$0xff] %v359_v32 }
  0xa3   :  { %71 = vst [vmem:[#allocation4 + $0x8] sm:$0xff] %v361_v33 }
  0xa4 PF:  { %p129_p1 = scmp.ne.s32.totalorder %s835_s0, 0 }
  0xa5   :  { %v405_v34 = vmov (!%p129_p1), 0   ;;  %v99_v35 = vlaneseq (!%p129_p1)  ;;  %v851_v57 = vmov (!%p129_p1), 0  ;;  %v406_v58 = vmov (!%p129_p1), 2139095040  }
  0xa6   :  { %77 = sbr.rel (%p129_p1) target bundleno = 343 (0x157), region = 17  ;;  %363 = vset.pattern.permute.xlu1 (!%p129_p1), %v405_v34  ;;  %362 = vset.pattern.permute.xlu0 (!%p129_p1), %v405_v34  ;;  %v865_v7 = vmov (!%p129_p1), 0  ;;  %v871_v10 = vmov (!%p129_p1), 0 }
  0xa7   :  { %90 = vperm.xlu1 (!%p129_p1), %363, %v16_v2   ;;  %80 = vperm.xlu0 (!%p129_p1), %362, %v14_v0   ;;  %v100_v36 = vshrl.u32 (!%p129_p1), %v99_v35, 7 }
  0xa9   :  { %v101_v37 = vsub.s32 (!%p129_p1), 0, %v100_v36 }
  0xab   :  { %95 = vperm.xlu1 (!%p129_p1), %363, %v17_v3   ;;  %85 = vperm.xlu0 (!%p129_p1), %362, %v15_v1   ;;  %v457_v38 = vrot.slane (!%p129_p1), %v445_v4, %v101_v37  ;;  %v861_v4 = vmov (!%p129_p1), 0 }
  0xad   :  { %v460_v39 = vand.u32 2147483647, %v457_v38  ;;  %v139_v41 = vtrunc.f32 %v457_v38  ;;  %vm844_vm5 = vcmp.lt.f32.partialorder %v457_v38, 0 }
  0xae   :  { %v511_v59 = vsel %vm844_vm5, 0, %v406_v58 }
  0xaf   :  { %v143_v40 = vtrunc.f32 %v460_v39  ;;  %vm839_vm0 = vcmp.eq.f32.partialorder %v460_v39, 2139095040  ;;  %vm140_vm1 = vcmp.ne.f32.partialorder %v457_v38, %v139_v41  ;;  %vm142_vm6 = vcmp.lt.f32.partialorder %v460_v39, 1266679808 }
  0xb0   :  { %vm487_vm2 = vmor %vm140_vm1, %vm839_vm0  ;;  %v171_v0 = vxor.u32 2147483648, %v511_v59 }
  0xb1   :  { %v144_v45 = vcvt.f32.s32 %v143_v40  ;;  %vm147_vm4 = vmneg %vm487_vm2 }
  0xb3   :  { %v145_v48 = vand.u32 1, %v144_v45 }
  0xb5   :  { %vm146_vm3 = vcmp.eq.s32.totalorder %v145_v48, 1 }
  0xb6   :  { %vm148_vm7 = vmand %vm146_vm3, %vm147_vm4 }
  0xb7   :  { %vm504_vm10 = vmand %vm142_vm6, %vm148_vm7 }
  0xb8   :  { %v852_v57 = vsel %vm504_vm10, 4294967295, %v851_v57  ;;  %v593_v9 = vsel %vm504_vm10, %v171_v0, %v511_v59 }
 0x126   :  { %v464_v42 = vpop.permute.xlu1 %90  ;;  %v466_v43 = vpop.permute.xlu0 %80 }
 0x127   :  { %v469_v44 = vand.u32 2147483647, %v464_v42  ;;  %v472_v46 = vand.u32 2147483647, %v466_v43  ;;  %vm841_vm9 = vcmp.lt.f32.partialorder %v464_v42, 0  ;;  %vm840_vm11 = vcmp.eq.f32.partialorder %v464_v42, 0 }
 0x128   :  { %vm523_vm13 = vmand %vm841_vm9, %vm487_vm2  ;;  %vm257_vm15 = vcmp.lt.s32.totalorder %v464_v42, 0  ;;  %vm842_vm3 = vcmp.lt.f32.partialorder %v466_v43, 0  ;;  %vm843_vm6 = vcmp.eq.f32.partialorder %v466_v43, 0  ;;  %vm153_vm7 = vcmp.lt.s32.totalorder %v466_v43, 0 }
 0x129   :  { %364 = vlog2.f32 %v469_v44  ;;  %vm258_vm8 = vcmp.gt.f32.partialorder %v469_v44, 1065353216  ;;  %vm154_vm14 = vcmp.gt.f32.partialorder %v472_v46, 1065353216  ;;  %vm533_vm1 = vmand %vm844_vm5, %vm840_vm11 }
 0x12a   :  { %366 = vlog2.f32 %v472_v46  ;;  %v478_v47 = vpop.permute.xlu1 %95  ;;  %v483_v50 = vpop.permute.xlu0 %85  ;;  %vm515_vm12 = vmxor %vm844_vm5, %vm258_vm8 }
 0x12b   :  { %v481_v49 = vand.u32 2147483647, %v478_v47  ;;  %v493_v52 = vand.u32 2147483647, %v483_v50  ;;  %vm548_vm8 = vmxor %vm844_vm5, %vm154_vm14 }
 0x12c   :  { %vm554_vm0 = vmand %vm257_vm15, %vm504_vm10 }
 0x12d   :  { %368 = vlog2.f32 %v481_v49  ;;  %v862_v4 = vsel %vm554_vm0, 4294967295, %v861_v4  ;;  %vm564_vm4 = vmand %vm842_vm3, %vm487_vm2  ;;  %vm874_vm15 = vcmp.gt.f32.partialorder %v481_v49, 1065353216 }
 0x12e   :  { %370 = vlog2.f32 %v493_v52  ;;  %vm575_vm11 = vmand %vm153_vm7, %vm504_vm10  ;;  %vm869_vm10 = vcmp.ne.f32.partialorder %v457_v38, %v457_v38  ;;  %vm873_vm7 = vcmp.lt.f32.partialorder %v457_v38, 0 }
 0x12f   :  { %v866_v7 = vsel %vm575_vm11, 4294967295, %v865_v7  ;;  %vm583_vm3 = vmand %vm844_vm5, %vm843_vm6  ;;  %vm870_vm11 = vcmp.ne.f32.partialorder %v464_v42, %v464_v42  ;;  %v158_v11 = vsel %vm873_vm7, 2139095040, %v405_v34  ;;  %vm880_vm6 = vcmp.eq.f32.partialorder %v464_v42, 1065353216 }
 0x130   :  { %vm610_vm0 = vmor %vm870_vm11, %vm869_vm10  ;;  %vm878_vm11 = vcmp.lt.f32.partialorder %v464_v42, 0 }
 0x131   :  { %v872_v10 = vsel %vm610_vm0, 4294967295, %v871_v10  ;;  %vm875_vm9 = vmmov %vm873_vm7  ;;  %v277_v14 = vsel %vm878_vm11, %v593_v9, %v511_v59  ;;  %vm879_vm7 = vcmp.eq.f32.partialorder %v457_v38, 0 }
 0x132   :  { %vm621_vm5 = vmxor %vm875_vm9, %vm874_vm15  ;;  %vm884_vm15 = vcmp.ne.f32.partialorder %v466_v43, %v466_v43 }
 0x133   :  { %v365_v53 = vpop.eup %364  ;;  %vm635_vm0 = vmor %vm880_vm6, %vm879_vm7  ;;  %vm888_vm7 = vcmp.lt.f32.partialorder %v466_v43, 0 }
 0x134   :  { %v367_v54 = vpop.eup %366  ;;  %v236_v55 = vmul.f32 %v365_v53, %v457_v38  ;;  %vm883_vm9 = vmmov %vm869_vm10  ;;  %v173_v20 = vsel %vm888_vm7, %v593_v9, %v511_v59  ;;  %vm890_vm10 = vcmp.lt.f32.partialorder %v457_v38, 0  ;;  %vm915_vm7 = vcmp.eq.f32.partialorder %v472_v46, 2139095040 }
 0x135   :  { %v132_v56 = vmul.f32 %v367_v54, %v457_v38  ;;  %vm645_vm14 = vmor %vm884_vm15, %vm883_vm9  ;;  %vm847_vm9 = vcmp.lt.f32.partialorder %v478_v47, 0  ;;  %vm889_vm15 = vcmp.eq.f32.partialorder %v478_v47, 0 }
 0x136   :  { %372 = vpow2.f32 %v236_v55  ;;  %vm887_vm6 = vmor %vm533_vm1, %vm515_vm12  ;;  %vm893_vm12 = vcmp.eq.f32.partialorder %v464_v42, 0 }
 0x137   :  { %374 = vpow2.f32 %v132_v56  ;;  %v369_v61 = vpop.eup %368  ;;  %v270_v19 = vsel %vm887_vm6, 2139095040, %v405_v34  ;;  %vm667_vm11 = vmand %vm890_vm10, %vm889_vm15  ;;  %vm848_vm6 = vcmp.eq.f32.partialorder %v483_v50, 0  ;;  %vm896_vm15 = vcmp.gt.f32.partialorder %v493_v52, 1065353216 }
 0x138   :  { %v288_v1 = vmul.f32 %v369_v61, %v457_v38  ;;  %v371_v2 = vpop.eup %370  ;;  %vm321_vm1 = vmor %vm667_vm11, %vm621_vm5  ;;  %vm900_vm11 = vcmp.eq.f32.partialorder %v464_v42, 3212836864 }
 0x139   :  { %v184_v6 = vmul.f32 %v371_v2, %v457_v38  ;;  %vm894_vm10 = vmor %vm583_vm3, %vm548_vm8  ;;  %v272_v28 = vsel %vm900_vm11, 1065353216, %v270_v19  ;;  %v322_v33 = vsel %vm321_vm1, 2139095040, %v405_v34  ;;  %vm904_vm11 = vcmp.lt.f32.partialorder %v457_v38, 0 }
 0x13a   :  { %376 = vpow2.f32 %v288_v1  ;;  %v166_v24 = vsel %vm894_vm10, 2139095040, %v405_v34  ;;  %vm705_vm8 = vmand %vm847_vm9, %vm487_vm2  ;;  %vm323_vm10 = vcmp.eq.f32.partialorder %v478_v47, 3212836864  ;;  %vm907_vm3 = vcmp.eq.f32.partialorder %v466_v43, 3212836864 }
 0x13b   :  { %378 = vpow2.f32 %v184_v6  ;;  %v168_v36 = vsel %vm907_vm3, 1065353216, %v166_v24  ;;  %vm909_vm1 = vcmp.eq.f32.partialorder %v460_v39, 2139095040  ;;  %vm911_vm9 = vcmp.eq.f32.partialorder %v457_v38, 0 }
 0x13c   :  { %vm912_vm3 = vcmp.eq.f32.partialorder %v466_v43, 1065353216  ;;  %v324_v60 = vsel %vm323_vm10, 1065353216, %v322_v33 }
 0x140   :  { %v373_v13 = vpop.eup %372 }
 0x141   :  { %v375_v17 = vpop.eup %374  ;;  %v261_v18 = vsel %vm523_vm13, 2143289344, %v373_v13  ;;  %vm720_vm13 = vmand %vm904_vm11, %vm848_vm6  ;;  %vm916_vm11 = vnez %v872_v10 }
 0x142   :  { %v157_v22 = vsel %vm564_vm4, 2143289344, %v375_v17  ;;  %v263_v23 = vsel %vm893_vm12, %v158_v11, %v261_v18  ;;  %vm895_vm4 = vcmp.eq.f32.partialorder %v466_v43, 0  ;;  %vm897_vm12 = vcmp.lt.f32.partialorder %v457_v38, 0  ;;  %vm179_vm6 = vmor %vm912_vm3, %vm911_vm9 }
 0x143   :  { %v159_v25 = vsel %vm895_vm4, %v158_v11, %v157_v22  ;;  %v265_v26 = vxor.u32 2147483648, %v263_v23  ;;  %vm694_vm5 = vmxor %vm897_vm12, %vm896_vm15  ;;  %vm903_vm4 = vnez %v862_v4  ;;  %vm202_vm12 = vcmp.lt.f32.partialorder %v483_v50, 0 }
 0x144   :  { %v161_v29 = vxor.u32 2147483648, %v159_v25  ;;  %v377_v31 = vpop.eup %376  ;;  %vm910_vm15 = vmmov %vm909_vm1  ;;  %vm923_vm3 = vcmp.eq.f32.partialorder %v460_v39, 2139095040 }
 0x145   :  { %v266_v32 = vsel %vm903_vm4, %v265_v26, %v263_v23  ;;  %vm908_vm4 = vnez %v866_v7  ;;  %v313_v41 = vsel %vm705_vm8, 2143289344, %v377_v31  ;;  %vm205_vm8 = vcmp.lt.s32.totalorder %v483_v50, 0  ;;  %v379_v54 = vpop.eup %378  ;;  %vm208_vm9 = vmand %vm202_vm12, %vm487_vm2 }
 0x146   :  { %v162_v37 = vsel %vm908_vm4, %v161_v29, %v159_v25  ;;  %v273_v40 = vsel %vm909_vm1, %v272_v28, %v266_v32  ;;  %vm913_vm4 = vcmp.eq.f32.partialorder %v469_v44, 2139095040  ;;  %vm914_vm1 = vcmp.eq.f32.partialorder %v478_v47, 0  ;;  %vm919_vm10 = vmor %vm720_vm13, %vm694_vm5 }
 0x147   :  { %v169_v45 = vsel %vm910_vm15, %v168_v36, %v162_v37  ;;  %v278_v48 = vsel %vm913_vm4, %v277_v14, %v273_v40  ;;  %v315_v53 = vsel %vm914_vm1, %v158_v11, %v313_v41  ;;  %vm918_vm15 = vcmp.lt.s32.totalorder %v478_v47, 0 }
 0x148   :  { %v174_v55 = vsel %vm915_vm7, %v173_v20, %v169_v45  ;;  %v282_v56 = vsel %vm916_vm11, 2143289344, %v278_v48  ;;  %v317_v58 = vxor.u32 2147483648, %v315_v53  ;;  %vm917_vm7 = vnez %v852_v57 }
 0x149   :  { %v178_v44 = vsel %vm645_vm14, 2143289344, %v174_v55  ;;  %v284_v61 = vsel %vm635_vm0, 1065353216, %v282_v56  ;;  %vm316_vm11 = vmand %vm918_vm15, %vm917_vm7  ;;  %v209_v46 = vsel %vm208_vm9, 2143289344, %v379_v54  ;;  %v218_v51 = vsel %vm919_vm10, 2139095040, %v405_v34 }
 0x14a   :  { %v180_v62 = vsel %vm179_vm6, 1065353216, %v178_v44  ;;  %vm920_vm2 = vcmp.eq.f32.partialorder %v457_v38, 1065353216  ;;  %v318_v0 = vsel %vm316_vm11, %v317_v58, %v315_v53  ;;  %vm921_vm0 = vcmp.eq.f32.partialorder %v483_v50, 0  ;;  %vm212_vm9 = vmand %vm205_vm8, %vm917_vm7 }
 0x14b   :  { %v285_v63 = vsel %vm920_vm2, %v464_v42, %v284_v61  ;;  %v211_v1 = vsel %vm921_vm0, %v158_v11, %v209_v46  ;;  %vm922_vm14 = vmmov %vm920_vm2  ;;  %v325_v3 = vsel %vm923_vm3, %v324_v60, %v318_v0  ;;  %vm924_vm13 = vcmp.lt.f32.partialorder %v478_v47, 0 }
 0x14c   :  { %v181_v2 = vsel %vm922_vm14, %v466_v43, %v180_v62  ;;  %v329_v34 = vsel %vm924_vm13, %v593_v9, %v511_v59  ;;  %vm925_vm6 = vcmp.ne.f32.partialorder %v457_v38, %v457_v38  ;;  %vm926_vm5 = vcmp.ne.f32.partialorder %v478_v47, %v478_v47  ;;  %110 = vst [vmem:[#allocation4 + $0x10] sm:$0xff] %v285_v63 }
 0x14d   :  { %vm333_vm4 = vmor %vm926_vm5, %vm925_vm6  ;;  %v213_v42 = vxor.u32 2147483648, %v211_v1  ;;  %vm927_vm1 = vcmp.eq.f32.partialorder %v481_v49, 2139095040  ;;  %108 = vst [vmem:[#allocation4] sm:$0xff] %v181_v2  ;;  %vm219_vm15 = vcmp.eq.f32.partialorder %v483_v50, 3212836864  ;;  %vm227_vm11 = vcmp.ne.f32.partialorder %v483_v50, %v483_v50 }
 0x14e   :  { %v330_v43 = vsel %vm927_vm1, %v329_v34, %v325_v3  ;;  %vm928_vm10 = vcmp.eq.f32.partialorder %v457_v38, 0  ;;  %vm929_vm2 = vcmp.eq.f32.partialorder %v478_v47, 1065353216  ;;  %vm204_vm14 = vcmp.eq.f32.partialorder %v483_v50, 1065353216  ;;  %vm932_vm13 = vmmov %vm925_vm6 }
 0x14f   :  { %v334_v4 = vsel %vm333_vm4, 2143289344, %v330_v43  ;;  %vm335_vm0 = vmor %vm929_vm2, %vm928_vm10  ;;  %v214_v49 = vsel %vm212_vm9, %v213_v42, %v211_v1  ;;  %v220_v5 = vsel %vm219_vm15, 1065353216, %v218_v51  ;;  %vm207_vm3 = vcmp.eq.f32.partialorder %v493_v52, 2139095040 }
 0x150   :  { %v336_v6 = vsel %vm335_vm0, 1065353216, %v334_v4  ;;  %vm930_vm8 = vcmp.eq.f32.partialorder %v460_v39, 2139095040  ;;  %v225_v7 = vsel %vm202_vm12, %v593_v9, %v511_v59  ;;  %vm931_vm7 = vcmp.eq.f32.partialorder %v457_v38, 1065353216  ;;  %vm229_vm6 = vmor %vm227_vm11, %vm932_vm13 }
 0x151   :  { %v221_v57 = vsel %vm930_vm8, %v220_v5, %v214_v49  ;;  %v337_v8 = vsel %vm931_vm7, %v478_v47, %v336_v6  ;;  %vm933_vm5 = vmmov %vm928_vm10 }
 0x152   :  { %v226_v10 = vsel %vm207_vm3, %v225_v7, %v221_v57  ;;  %111 = vst [vmem:[#allocation4 + $0x18] sm:$0xff] %v337_v8  ;;  %vm231_vm4 = vmor %vm204_vm14, %vm933_vm5 }
 0x153   :  { %v230_v11 = vsel %vm229_vm6, 2143289344, %v226_v10  ;;  %vm934_vm1 = vmmov %vm931_vm7 }
 0x154   :  { %v232_v39 = vsel %vm231_vm4, 1065353216, %v230_v11 }
 0x155   :  { %v233_v52 = vsel %vm934_vm1, %v483_v50, %v232_v39 }
 0x156   :  { %109 = vst [vmem:[#allocation4 + $0x8] sm:$0xff] %v233_v52 }
 0x157 PF:  { %s407_s0 = smov [#allocation4]  }
 0x158   :  { %s117_s24 = sshll.u32 %s407_s0, 4  ;;  %s118_s24 = int_to_ptr.vmem [resolvable:$true] %s117_s24 }
 0x159   :  { %s380_s25 = scalar_lea.vmem %s118_s24, 512  ;;  %p385_p3 = scmp.lt.s32.totalorder %s118_s24, %s118_s24 }
 0x15a   :  { %p381_p2 = scmp.ne.s32.totalorder %s118_s24, %s380_s25  ;;  %p386_p4 = scmp.lt.s32.totalorder %s380_s25, %s380_s25 }
 0x15c   :  { %p387_p5 = por %p386_p4, %p385_p3 }
 0x15e   :  { %p388_p6 = pnand %p387_p5, %p381_p2 }
 0x160   :  { %391 = shalt.err (!%p388_p6)
}
 0x161   :  { %s392_s28 = scalar_lea.hbm %s838_s3, 512 }
 0x162   :  { %p393_p7 = scmp.ne.s32.totalorder %s838_s3, %s392_s28  ;;  %p396_p8 = scmp.lt.u32.totalorder %s392_s28, %s838_s3 }
 0x164   :  { %p398_p9 = pnand %p396_p8, %p393_p7 }
 0x166   :  { %401 = shalt.err (!%p398_p9)
}
 0x167   :  { %s408_s6 = smov 128   ;;  %s409_s7 = smov 8  }
 0x168   :  { %123 = dma.vmem_to_hbm [thread:$0]  %s118_s24, 512, %s838_s3, [#allocation5], %s408_s6, %s408_s6, %s409_s7  }
 0x169   :  { %402 = dma.done.wait [#allocation5], 512  }
 0x16a   :  { %403 = vsyncadd [#allocation5], 4294966784 }
 0x16b   :  { %127 = vsyncpa [#allocation5], 1 }

</bundles_post_ra>
